<compile_context>
chip_gen: v6e
topology: v6e:2x2x1
jax: 0.10.0
libtpu: 0.0.40
codegen_flags: <defaults>
</compile_context>

<pallas_src>
import functools

import jax
import jax.numpy as jnp
from jax.experimental import pallas as pl
from jax.experimental.pallas import tpu as pltpu

MARGIN = 2.0
EPS = 1e-6  # matches F.pairwise_distance default


def _cdiv(a, b):
    return -(-a // b)


def _round_up(a, b):
    return _cdiv(a, b) * b


def _vmem_config():
    """Return (pipeline_budget_bytes, vmem_limit_bytes, tensorcores_per_chip)."""
    vmem_bytes = 0
    try:
        vmem_bytes = int(getattr(pltpu.get_tpu_info(), "vmem_capacity_bytes", 0))
    except Exception:
        vmem_bytes = 0
    if vmem_bytes > 64 * 1024 * 1024:
        # v5e / v6e: 128 MiB VMEM, single TensorCore per chip.
        return 64 * 1024 * 1024, 96 * 1024 * 1024, 1
    # v7x (64 MiB VMEM per TensorCore, 2 TCs/chip) or unknown chip: conservative.
    return 22 * 1024 * 1024, 40 * 1024 * 1024, 2


def _auto_tile_s(hw, c, itemsize, gt_itemsize, budget, num_super):
    """Pick TILE_S (multiple of 8 sublane rows of 128 pixels) from the budget."""
    s = _cdiv(hw, 128)
    # VMEM bytes per sublane-row (128 pixels) of one tile:
    #   2 feature inputs x 2 pipeline buffers : 4 * c * itemsize * 128
    #   gt input x 2 pipeline buffers         : 2 * gt_itemsize * 128
    #   3 f32 accumulators                    : 3 * 4 * 128
    #   ~6 f32 elementwise temporaries        : 6 * 4 * 128
    per_row = (4 * c * itemsize + 2 * gt_itemsize + 3 * 4 + 6 * 4) * 128
    cap = max(8, (budget // per_row) // 8 * 8)
    cap = max(8, min(cap, _round_up(_cdiv(s, num_super), 8)))
    if hw % 128 == 0:
        # Prefer a tile that divides the work into a multiple of num_super
        # tiles: avoids any wrapper-side pad (an extra HBM copy of the inputs).
        t = cap
        while t >= 8 and t * 4 >= cap:
            if s % t == 0 and (s // t) % num_super == 0:
                return t
            t -= 8
    return cap


def _cml_kernel(t0_ref, t1_ref, gt_ref, out_ref,
                acc_d2_ref, acc_h2_ref, acc_gt_ref, *, c, margin, eps):
    """Process one (C, TILE_S, 128) tile; accumulate dist^2 / hinge^2 / gt."""
    i = pl.program_id(1)  # reduction axis over pixel tiles

    @pl.when(i == 0)
    def _init():
        acc_d2_ref[...] = jnp.zeros_like(acc_d2_ref)
        acc_h2_ref[...] = jnp.zeros_like(acc_h2_ref)
        acc_gt_ref[...] = jnp.zeros_like(acc_gt_ref)

    # Channel reduction as leading-axis adds; every temporary is a dense
    # (TILE_S, 128) f32 slab (full 8-sublane vreg density, bounded VMEM).
    if c <= 32:
        dist2 = None
        for ci in range(c):
            d = t0_ref[ci].astype(jnp.float32) - t1_ref[ci].astype(jnp.float32) + eps
            dist2 = d * d if dist2 is None else dist2 + d * d
    else:
        def body(ci, acc):
            d = t0_ref[ci].astype(jnp.float32) - t1_ref[ci].astype(jnp.float32) + eps
            return acc + d * d
        dist2 = jax.lax.fori_loop(0, c, body,
                                  jnp.zeros(t0_ref.shape[1:], jnp.float32))

    hinge = jnp.maximum(margin - jnp.sqrt(dist2), 0.0)

    # Pure VPU accumulation; the cross-lane reduce is deferred to the finalize.
    acc_d2_ref[...] = acc_d2_ref[...] + dist2
    acc_h2_ref[...] = acc_h2_ref[...] + hinge * hinge
    acc_gt_ref[...] = acc_gt_ref[...] + gt_ref[0].astype(jnp.float32)

    @pl.when(i == pl.num_programs(1) - 1)
    def _finalize():
        sum_d2 = jnp.sum(acc_d2_ref[...])
        sum_h2 = jnp.sum(acc_h2_ref[...])
        sum_gt = jnp.sum(acc_gt_ref[...])
        lane = jax.lax.broadcasted_iota(jnp.int32, (1, 128), 1)
        out_ref[...] = jnp.where(
            lane == 0, sum_d2,
            jnp.where(lane == 1, sum_h2,
                      jnp.where(lane == 2, sum_gt, 0.0)))


def constractive_mask_loss(out_t0, out_t1, ground_truth, margin=MARGIN,
                           *, tile_s=None, num_super=None):
    n, c, h, w = out_t0.shape
    assert n == 1, "original module's .view(c, h*w) implies batch size 1"
    hw = h * w

    budget, vmem_limit, num_cores = _vmem_config()
    itemsize = jnp.dtype(out_t0.dtype).itemsize
    gt_itemsize = jnp.dtype(ground_truth.dtype).itemsize

    if num_super is None:
        num_super = num_cores
    num_super = max(1, int(num_super))
    if tile_s is None:
        tile_s = _auto_tile_s(hw, c, itemsize, gt_itemsize, budget, num_super)
    assert tile_s > 0 and tile_s % 8 == 0, tile_s

    s = _cdiv(hw, 128)
    num_tiles = _round_up(_cdiv(s, tile_s), num_super)
    tiles_per_super = num_tiles // num_super
    s_pad = num_tiles * tile_s
    hw_pad = s_pad * 128
    n_pad = hw_pad - hw

    # view-style reshape; keep native dtype on the wire (no forced f32 cast).
    t0 = out_t0.reshape(c, hw)
    t1 = out_t1.reshape(c, hw)
    gt = ground_truth.reshape(1, hw)
    if n_pad:
        t0 = jnp.pad(t0, ((0, 0), (0, n_pad)))
        t1 = jnp.pad(t1, ((0, 0), (0, n_pad)))
        gt = jnp.pad(gt, ((0, 0), (0, n_pad)))
    t0 = t0.reshape(c, s_pad, 128)
    t1 = t1.reshape(c, s_pad, 128)
    gt = gt.reshape(1, s_pad, 128)

    def in_map(p, i):
        return (0, p * tiles_per_super + i, 0)

    kernel = functools.partial(_cml_kernel, c=c, margin=float(margin), eps=EPS)

    # TODO(synk): a Buffered(3) pipeline-depth sweep on the two feature inputs
    # could be tried for mid-size tiles; default double-buffering kept here.
    partials = pl.pallas_call(
        kernel,
        out_shape=jax.ShapeDtypeStruct((1, num_super * 128), jnp.float32),
        grid_spec=pltpu.PrefetchScalarGridSpec(
            num_scalar_prefetch=0,
            grid=(num_super, tiles_per_super),
            in_specs=[
                pl.BlockSpec((c, tile_s, 128), in_map),
                pl.BlockSpec((c, tile_s, 128), in_map),
                pl.BlockSpec((1, tile_s, 128), in_map),
            ],
            out_specs=pl.BlockSpec((1, 128), lambda p, i: (0, p)),
            scratch_shapes=[
                pltpu.VMEM((tile_s, 128), jnp.float32),  # running sum of dist^2
                pltpu.VMEM((tile_s, 128), jnp.float32),  # running sum of hinge^2
                pltpu.VMEM((tile_s, 128), jnp.float32),  # running sum of gt
            ],
        ),
        compiler_params=pltpu.CompilerParams(
            dimension_semantics=("parallel", "arbitrary"),
            vmem_limit_bytes=vmem_limit,
        ),
    )(t0, t1, gt)

    part = partials.reshape(num_super, 128)
    sum_d2 = jnp.sum(part[:, 0])
    sum_h2 = jnp.sum(part[:, 1])
    sum_lbl = jnp.sum(part[:, 2])

    if n_pad:
        # Zero-padded pixels are NOT neutral (dist = eps*sqrt(C), hinge ~ margin);
        # subtract their exact analytic contribution.  Padded gt lanes are zero,
        # so sum_lbl needs no correction.
        eps32 = jnp.float32(EPS)
        pad_d2 = jnp.float32(c) * eps32 * eps32
        pad_h = jnp.maximum(jnp.float32(margin) - jnp.sqrt(pad_d2), 0.0)
        sum_d2 = sum_d2 - jnp.float32(n_pad) * pad_d2
        sum_h2 = sum_h2 - jnp.float32(n_pad) * pad_h * pad_h

    hwf = jnp.float32(hw)
    return (hwf - sum_lbl) * sum_d2 + sum_lbl * sum_h2


def _reference_loss(out_t0, out_t1, ground_truth, margin=MARGIN):
    """Pure-JAX reference mirroring the PyTorch broadcast literally."""
    n, c, h, w = out_t0.shape
    hw = h * w
    t0 = out_t0.reshape(c, hw).T.astype(jnp.float32)        # (HW, C)
    t1 = out_t1.reshape(c, hw).T.astype(jnp.float32)        # (HW, C)
    gt = ground_truth.reshape(1, hw).T.astype(jnp.float32)  # (HW, 1)
    dist = jnp.sqrt(jnp.sum((t0 - t1 + EPS) ** 2, axis=1))  # (HW,)
    hinge = jnp.maximum(margin - dist, 0.0)
    mat = (1.0 - gt) * (dist ** 2) + gt * (hinge ** 2)      # (HW, HW) broadcast
    return jnp.sum(mat)


if __name__ == "__main__":
    key = jax.random.PRNGKey(0)
    keys = jax.random.split(key, 12)

    # Case 1: small f32 input, fully automatic (budget-derived) tiling.
    n, c, h, w = 1, 4, 16, 16
    a0 = jax.random.normal(keys[0], (n, c, h, w), dtype=jnp.float32)
    a1 = jax.random.normal(keys[1], (n, c, h, w), dtype=jnp.float32)
    gt_a = (jax.random.uniform(keys[2], (n, 1, h, w)) > 0.5).astype(jnp.float32)
    loss_a = jax.block_until_ready(constractive_mask_loss(a0, a1, gt_a))
    ref_a = jax.block_until_ready(_reference_loss(a0, a1, gt_a))
    assert jnp.allclose(loss_a, ref_a, rtol=5e-4, atol=1.0), (loss_a, ref_a)

    # Case 2: bf16 inputs with forced small tiles and 2 "super" blocks, so the
    # resident accumulators (>1 reduction step per super), the tail padding and
    # the parallel leading axis are all exercised regardless of chip.
    n, c, h, w = 1, 8, 48, 48
    b0 = jax.random.normal(keys[3], (n, c, h, w), dtype=jnp.float32).astype(jnp.bfloat16)
    b1 = jax.random.normal(keys[4], (n, c, h, w), dtype=jnp.float32).astype(jnp.bfloat16)
    gt_b = (jax.random.uniform(keys[5], (n, 1, h, w)) > 0.5).astype(jnp.float32)
    loss_b = jax.block_until_ready(
        constractive_mask_loss(b0, b1, gt_b, tile_s=8, num_super=2))
    ref_b = jax.block_until_ready(_reference_loss(b0, b1, gt_b))
    assert jnp.allclose(loss_b, ref_b, rtol=2e-3, atol=1.0), (loss_b, ref_b)

    # Case 3: odd channel count and HW not a multiple of 128 (lane padding +
    # exact wrapper-side correction), automatic tiling.
    n, c, h, w = 1, 3, 15, 15
    c0 = jax.random.normal(keys[6], (n, c, h, w), dtype=jnp.float32)
    c1 = jax.random.normal(keys[7], (n, c, h, w), dtype=jnp.float32)
    gt_c = (jax.random.uniform(keys[8], (n, 1, h, w)) > 0.5).astype(jnp.float32)
    loss_c = jax.block_until_ready(constractive_mask_loss(c0, c1, gt_c))
    ref_c = jax.block_until_ready(_reference_loss(c0, c1, gt_c))
    assert jnp.allclose(loss_c, ref_c, rtol=5e-4, atol=1.0), (loss_c, ref_c)

    # Case 4: exactly tile-aligned HW (no padding path at all), single super.
    n, c, h, w = 1, 8, 32, 32
    d0 = jax.random.normal(keys[9], (n, c, h, w), dtype=jnp.float32)
    d1 = jax.random.normal(keys[10], (n, c, h, w), dtype=jnp.float32)
    gt_d = (jax.random.uniform(keys[11], (n, 1, h, w)) > 0.5).astype(jnp.float32)
    loss_d = jax.block_until_ready(
        constractive_mask_loss(d0, d1, gt_d, tile_s=8, num_super=1))
    ref_d = jax.block_until_ready(_reference_loss(d0, d1, gt_d))
    assert jnp.allclose(loss_d, ref_d, rtol=5e-4, atol=1.0), (loss_d, ref_d)

    # TODO(synk): dist_flag='l1'/'cos' and thresh_flag=True branches of the
    # original module are not implemented (module defaults use 'l2'/False).
    print("KERNEL_OK")
</pallas_src>

<mosaic_0001>
module attributes {stable_mosaic.version = 11 : i64} {
  func.func @_cml_kernel(%arg0: i32, %arg1: i32, %arg2: memref<4x8x128xf32, #tpu.memory_space<vmem>>, %arg3: memref<4x8x128xf32, #tpu.memory_space<vmem>>, %arg4: memref<1x8x128xf32, #tpu.memory_space<vmem>>, %arg5: memref<1x128xf32, #tpu.memory_space<vmem>>, %arg6: memref<8x128xf32, #tpu.memory_space<vmem>>, %arg7: memref<8x128xf32, #tpu.memory_space<vmem>>, %arg8: memref<8x128xf32, #tpu.memory_space<vmem>>) attributes {dimension_semantics = [#tpu.dimension_semantics<parallel>, #tpu.dimension_semantics<arbitrary>], iteration_bounds = array<i64: 2, 1>, scalar_prefetch = 0 : i64, scratch_operands = 3 : i64, tpu.core_type = #tpu.core_type<tc>, window_params = [{transform_indices = @transform_0, window_bounds = array<i64: 4, 8, 128>}, {transform_indices = @transform_1, window_bounds = array<i64: 4, 8, 128>}, {transform_indices = @transform_2, window_bounds = array<i64: 1, 8, 128>}, {transform_indices = @transform_3, window_bounds = array<i64: 1, 128>}]} {
    %c0_i32 = arith.constant 0 : i32
    %0 = arith.cmpi eq, %arg1, %c0_i32 : i32
    %1 = arith.extui %0 : i1 to i32
    %c0_i32_0 = arith.constant 0 : i32
    %2 = arith.cmpi ne, %1, %c0_i32_0 : i32
    scf.if %2 {
      %cst_43 = arith.constant 0.000000e+00 : f32
      %58 = vector.broadcast %cst_43 : f32 to vector<8x128xf32>
      %c0_44 = arith.constant 0 : index
      %c0_45 = arith.constant 0 : index
      %59 = vector.load %arg6[%c0_44, %c0_45] : memref<8x128xf32, #tpu.memory_space<vmem>>, vector<8x128xf32>
      tpu.vector_store %arg6[%c0_44, %c0_45], %58 {strides = array<i32>} : memref<8x128xf32, #tpu.memory_space<vmem>>, vector<8x128xf32>,
      %cst_46 = arith.constant 0.000000e+00 : f32
      %60 = vector.broadcast %cst_46 : f32 to vector<8x128xf32>
      %c0_47 = arith.constant 0 : index
      %c0_48 = arith.constant 0 : index
      %61 = vector.load %arg7[%c0_47, %c0_48] : memref<8x128xf32, #tpu.memory_space<vmem>>, vector<8x128xf32>
      tpu.vector_store %arg7[%c0_47, %c0_48], %60 {strides = array<i32>} : memref<8x128xf32, #tpu.memory_space<vmem>>, vector<8x128xf32>,
      %cst_49 = arith.constant 0.000000e+00 : f32
      %62 = vector.broadcast %cst_49 : f32 to vector<8x128xf32>
      %c0_50 = arith.constant 0 : index
      %c0_51 = arith.constant 0 : index
      %63 = vector.load %arg8[%c0_50, %c0_51] : memref<8x128xf32, #tpu.memory_space<vmem>>, vector<8x128xf32>
      tpu.vector_store %arg8[%c0_50, %c0_51], %62 {strides = array<i32>} : memref<8x128xf32, #tpu.memory_space<vmem>>, vector<8x128xf32>,
    } else {
    }
    %c0 = arith.constant 0 : index
    %c0_1 = arith.constant 0 : index
    %c0_2 = arith.constant 0 : index
    %3 = vector.load %arg2[%c0, %c0_1, %c0_2] : memref<4x8x128xf32, #tpu.memory_space<vmem>>, vector<1x8x128xf32>
    %4 = vector.shape_cast %3 : vector<1x8x128xf32> to vector<8x128xf32>
    %c0_3 = arith.constant 0 : index
    %c0_4 = arith.constant 0 : index
    %c0_5 = arith.constant 0 : index
    %5 = vector.load %arg3[%c0_3, %c0_4, %c0_5] : memref<4x8x128xf32, #tpu.memory_space<vmem>>, vector<1x8x128xf32>
    %6 = vector.shape_cast %5 : vector<1x8x128xf32> to vector<8x128xf32>
    %7 = arith.subf %4, %6 : vector<8x128xf32>
    %cst = arith.constant 9.99999997E-7 : f32
    %8 = vector.broadcast %cst : f32 to vector<8x128xf32>
    %9 = arith.addf %7, %8 : vector<8x128xf32>
    %10 = arith.mulf %9, %9 : vector<8x128xf32>
    %c1 = arith.constant 1 : index
    %c0_6 = arith.constant 0 : index
    %c0_7 = arith.constant 0 : index
    %11 = vector.load %arg2[%c1, %c0_6, %c0_7] : memref<4x8x128xf32, #tpu.memory_space<vmem>>, vector<1x8x128xf32>
    %12 = vector.shape_cast %11 : vector<1x8x128xf32> to vector<8x128xf32>
    %c1_8 = arith.constant 1 : index
    %c0_9 = arith.constant 0 : index
    %c0_10 = arith.constant 0 : index
    %13 = vector.load %arg3[%c1_8, %c0_9, %c0_10] : memref<4x8x128xf32, #tpu.memory_space<vmem>>, vector<1x8x128xf32>
    %14 = vector.shape_cast %13 : vector<1x8x128xf32> to vector<8x128xf32>
    %15 = arith.subf %12, %14 : vector<8x128xf32>
    %cst_11 = arith.constant 9.99999997E-7 : f32
    %16 = vector.broadcast %cst_11 : f32 to vector<8x128xf32>
    %17 = arith.addf %15, %16 : vector<8x128xf32>
    %18 = arith.mulf %17, %17 : vector<8x128xf32>
    %19 = arith.addf %10, %18 : vector<8x128xf32>
    %c2 = arith.constant 2 : index
    %c0_12 = arith.constant 0 : index
    %c0_13 = arith.constant 0 : index
    %20 = vector.load %arg2[%c2, %c0_12, %c0_13] : memref<4x8x128xf32, #tpu.memory_space<vmem>>, vector<1x8x128xf32>
    %21 = vector.shape_cast %20 : vector<1x8x128xf32> to vector<8x128xf32>
    %c2_14 = arith.constant 2 : index
    %c0_15 = arith.constant 0 : index
    %c0_16 = arith.constant 0 : index
    %22 = vector.load %arg3[%c2_14, %c0_15, %c0_16] : memref<4x8x128xf32, #tpu.memory_space<vmem>>, vector<1x8x128xf32>
    %23 = vector.shape_cast %22 : vector<1x8x128xf32> to vector<8x128xf32>
    %24 = arith.subf %21, %23 : vector<8x128xf32>
    %cst_17 = arith.constant 9.99999997E-7 : f32
    %25 = vector.broadcast %cst_17 : f32 to vector<8x128xf32>
    %26 = arith.addf %24, %25 : vector<8x128xf32>
    %27 = arith.mulf %26, %26 : vector<8x128xf32>
    %28 = arith.addf %19, %27 : vector<8x128xf32>
    %c3 = arith.constant 3 : index
    %c0_18 = arith.constant 0 : index
    %c0_19 = arith.constant 0 : index
    %29 = vector.load %arg2[%c3, %c0_18, %c0_19] : memref<4x8x128xf32, #tpu.memory_space<vmem>>, vector<1x8x128xf32>
    %30 = vector.shape_cast %29 : vector<1x8x128xf32> to vector<8x128xf32>
    %c3_20 = arith.constant 3 : index
    %c0_21 = arith.constant 0 : index
    %c0_22 = arith.constant 0 : index
    %31 = vector.load %arg3[%c3_20, %c0_21, %c0_22] : memref<4x8x128xf32, #tpu.memory_space<vmem>>, vector<1x8x128xf32>
    %32 = vector.shape_cast %31 : vector<1x8x128xf32> to vector<8x128xf32>
    %33 = arith.subf %30, %32 : vector<8x128xf32>
    %cst_23 = arith.constant 9.99999997E-7 : f32
    %34 = vector.broadcast %cst_23 : f32 to vector<8x128xf32>
    %35 = arith.addf %33, %34 : vector<8x128xf32>
    %36 = arith.mulf %35, %35 : vector<8x128xf32>
    %37 = arith.addf %28, %36 : vector<8x128xf32>
    %38 = math.sqrt %37 : vector<8x128xf32>
    %cst_24 = arith.constant 2.000000e+00 : f32
    %39 = vector.broadcast %cst_24 : f32 to vector<8x128xf32>
    %40 = arith.subf %39, %38 : vector<8x128xf32>
    %cst_25 = arith.constant 0.000000e+00 : f32
    %41 = vector.broadcast %cst_25 : f32 to vector<8x128xf32>
    %42 = arith.maximumf %40, %41 : vector<8x128xf32>
    %c0_26 = arith.constant 0 : index
    %c0_27 = arith.constant 0 : index
    %43 = vector.load %arg6[%c0_26, %c0_27] : memref<8x128xf32, #tpu.memory_space<vmem>>, vector<8x128xf32>
    %44 = arith.addf %43, %37 : vector<8x128xf32>
    %c0_28 = arith.constant 0 : index
    %c0_29 = arith.constant 0 : index
    %45 = vector.load %arg6[%c0_28, %c0_29] : memref<8x128xf32, #tpu.memory_space<vmem>>, vector<8x128xf32>
    tpu.vector_store %arg6[%c0_28, %c0_29], %44 {strides = array<i32>} : memref<8x128xf32, #tpu.memory_space<vmem>>, vector<8x128xf32>,
    %c0_30 = arith.constant 0 : index
    %c0_31 = arith.constant 0 : index
    %46 = vector.load %arg7[%c0_30, %c0_31] : memref<8x128xf32, #tpu.memory_space<vmem>>, vector<8x128xf32>
    %47 = arith.mulf %42, %42 : vector<8x128xf32>
    %48 = arith.addf %46, %47 : vector<8x128xf32>
    %c0_32 = arith.constant 0 : index
    %c0_33 = arith.constant 0 : index
    %49 = vector.load %arg7[%c0_32, %c0_33] : memref<8x128xf32, #tpu.memory_space<vmem>>, vector<8x128xf32>
    tpu.vector_store %arg7[%c0_32, %c0_33], %48 {strides = array<i32>} : memref<8x128xf32, #tpu.memory_space<vmem>>, vector<8x128xf32>,
    %c0_34 = arith.constant 0 : index
    %c0_35 = arith.constant 0 : index
    %50 = vector.load %arg8[%c0_34, %c0_35] : memref<8x128xf32, #tpu.memory_space<vmem>>, vector<8x128xf32>
    %c0_36 = arith.constant 0 : index
    %c0_37 = arith.constant 0 : index
    %c0_38 = arith.constant 0 : index
    %51 = vector.load %arg4[%c0_36, %c0_37, %c0_38] : memref<1x8x128xf32, #tpu.memory_space<vmem>>, vector<1x8x128xf32>
    %52 = vector.shape_cast %51 : vector<1x8x128xf32> to vector<8x128xf32>
    %53 = arith.addf %50, %52 : vector<8x128xf32>
    %c0_39 = arith.constant 0 : index
    %c0_40 = arith.constant 0 : index
    %54 = vector.load %arg8[%c0_39, %c0_40] : memref<8x128xf32, #tpu.memory_space<vmem>>, vector<8x128xf32>
    tpu.vector_store %arg8[%c0_39, %c0_40], %53 {strides = array<i32>} : memref<8x128xf32, #tpu.memory_space<vmem>>, vector<8x128xf32>,
    %c0_i32_41 = arith.constant 0 : i32
    %55 = arith.cmpi eq, %arg1, %c0_i32_41 : i32
    %56 = arith.extui %55 : i1 to i32
    %c0_i32_42 = arith.constant 0 : i32
    %57 = arith.cmpi ne, %56, %c0_i32_42 : i32
    scf.if %57 {
      %c0_43 = arith.constant 0 : index
      %c0_44 = arith.constant 0 : index
      %58 = vector.load %arg6[%c0_43, %c0_44] : memref<8x128xf32, #tpu.memory_space<vmem>>, vector<8x128xf32>
      %59 = vector.shape_cast %58 : vector<8x128xf32> to vector<1x8x128xf32>
      %cst_45 = arith.constant dense<0.000000e+00> : vector<1xf32>
      %60 = vector.multi_reduction <add>, %59, %cst_45 [1, 2] : vector<1x8x128xf32> to vector<1xf32>
      %61 = vector.shape_cast %60 : vector<1xf32> to vector<1x1x1xf32>
      %62 = vector.extract %61[0, 0, 0] : f32 from vector<1x1x1xf32>
      %c0_46 = arith.constant 0 : index
      %c0_47 = arith.constant 0 : index
      %63 = vector.load %arg7[%c0_46, %c0_47] : memref<8x128xf32, #tpu.memory_space<vmem>>, vector<8x128xf32>
      %64 = vector.shape_cast %63 : vector<8x128xf32> to vector<1x8x128xf32>
      %cst_48 = arith.constant dense<0.000000e+00> : vector<1xf32>
      %65 = vector.multi_reduction <add>, %64, %cst_48 [1, 2] : vector<1x8x128xf32> to vector<1xf32>
      %66 = vector.shape_cast %65 : vector<1xf32> to vector<1x1x1xf32>
      %67 = vector.extract %66[0, 0, 0] : f32 from vector<1x1x1xf32>
      %c0_49 = arith.constant 0 : index
      %c0_50 = arith.constant 0 : index
      %68 = vector.load %arg8[%c0_49, %c0_50] : memref<8x128xf32, #tpu.memory_space<vmem>>, vector<8x128xf32>
      %69 = vector.shape_cast %68 : vector<8x128xf32> to vector<1x8x128xf32>
      %cst_51 = arith.constant dense<0.000000e+00> : vector<1xf32>
      %70 = vector.multi_reduction <add>, %69, %cst_51 [1, 2] : vector<1x8x128xf32> to vector<1xf32>
      %71 = vector.shape_cast %70 : vector<1xf32> to vector<1x1x1xf32>
      %72 = vector.extract %71[0, 0, 0] : f32 from vector<1x1x1xf32>
      %73 = tpu.iota {dimensions = array<i32: 1>} : vector<1x128xi32>
      %c0_i32_52 = arith.constant 0 : i32
      %74 = vector.broadcast %c0_i32_52 : i32 to vector<1x128xi32>
      %75 = arith.cmpi eq, %73, %74 : vector<1x128xi32>
      %c1_i32 = arith.constant 1 : i32
      %76 = vector.broadcast %c1_i32 : i32 to vector<1x128xi32>
      %77 = arith.cmpi eq, %73, %76 : vector<1x128xi32>
      %c2_i32 = arith.constant 2 : i32
      %78 = vector.broadcast %c2_i32 : i32 to vector<1x128xi32>
      %79 = arith.cmpi eq, %73, %78 : vector<1x128xi32>
      %cst_53 = arith.constant 0.000000e+00 : f32
      %80 = vector.broadcast %72 : f32 to vector<1x128xf32>
      %81 = vector.broadcast %cst_53 : f32 to vector<1x128xf32>
      %82 = arith.select %79, %80, %81 : vector<1x128xi1>, vector<1x128xf32>
      %83 = vector.broadcast %67 : f32 to vector<1x128xf32>
      %84 = arith.select %77, %83, %82 : vector<1x128xi1>, vector<1x128xf32>
      %85 = vector.broadcast %62 : f32 to vector<1x128xf32>
      %86 = arith.select %75, %85, %84 : vector<1x128xi1>, vector<1x128xf32>
      %c0_54 = arith.constant 0 : index
      %c0_55 = arith.constant 0 : index
      %87 = vector.load %arg5[%c0_54, %c0_55] : memref<1x128xf32, #tpu.memory_space<vmem>>, vector<1x128xf32>
      tpu.vector_store %arg5[%c0_54, %c0_55], %86 {strides = array<i32>} : memref<1x128xf32, #tpu.memory_space<vmem>>, vector<1x128xf32>,
    } else {
    }
    return
  }
  func.func @transform_0(%arg0: i32, %arg1: i32) -> (i32, i32, i32) {
    %c1_i32 = arith.constant 1 : i32
    %0 = arith.muli %arg0, %c1_i32 : i32
    %1 = arith.addi %0, %arg1 : i32
    %c0_i32 = arith.constant 0 : i32
    %c0_i32_0 = arith.constant 0 : i32
    %c0_i32_1 = arith.constant 0 : i32
    return %c0_i32, %1, %c0_i32_0 : i32, i32, i32
  }
  func.func @transform_1(%arg0: i32, %arg1: i32) -> (i32, i32, i32) {
    %c1_i32 = arith.constant 1 : i32
    %0 = arith.muli %arg0, %c1_i32 : i32
    %1 = arith.addi %0, %arg1 : i32
    %c0_i32 = arith.constant 0 : i32
    %c0_i32_0 = arith.constant 0 : i32
    %c0_i32_1 = arith.constant 0 : i32
    return %c0_i32, %1, %c0_i32_0 : i32, i32, i32
  }
  func.func @transform_2(%arg0: i32, %arg1: i32) -> (i32, i32, i32) {
    %c1_i32 = arith.constant 1 : i32
    %0 = arith.muli %arg0, %c1_i32 : i32
    %1 = arith.addi %0, %arg1 : i32
    %c0_i32 = arith.constant 0 : i32
    %c0_i32_0 = arith.constant 0 : i32
    %c0_i32_1 = arith.constant 0 : i32
    return %c0_i32, %1, %c0_i32_0 : i32, i32, i32
  }
  func.func @transform_3(%arg0: i32, %arg1: i32) -> (i32, i32) {
    %c0_i32 = arith.constant 0 : i32
    %c0_i32_0 = arith.constant 0 : i32
    return %c0_i32, %arg0 : i32, i32
  }
}

</mosaic_0001>

<bundles_post_ra>
// kernel: tpu_custom_call.1
= control target key start
LH: loop header
LB: loop body
LE: loop exit
PB: predicated region body
PF: predicated region fallthrough
CT: control target
= control target key end

     0   :  { %s1016_s0 = inlined_call_operand.hbm [shape: f32[4,16,128], index: 0, kind: input, shape index: {}]   ;;  %s1017_s1 = inlined_call_operand.hbm [shape: f32[4,16,128], index: 1, kind: input, shape index: {}]   ;;  %s1018_s2 = inlined_call_operand.hbm [shape: f32[1,16,128], index: 2, kind: input, shape index: {}]   ;;  %s1019_s3 = inlined_call_operand.hbm [shape: f32[1,256], index: 3, kind: output, shape index: {}]  }
   0x1   :  { %1023 = sst [smem:[#allocation18_spill]] %s1016_s0 }
   0x2   :  { %1024 = sst [smem:[#allocation19_spill]] %s1017_s1 }
   0x3   :  { %8 = vsyncpa [#allocation6], 0 }
   0x4   :  { %10 = vsyncpa [#allocation6 + $0x1], 0 }
   0x5   :  { %11 = vsyncpa [#allocation9], 0 }
   0x6   :  { %13 = vsyncpa [#allocation9 + $0x1], 0 }
   0x7   :  { %14 = vsyncpa [#allocation7], 0 }
   0x8   :  { %16 = vsyncpa [#allocation7 + $0x1], 0  ;;  %s821_s12 = smov 0   ;;  %s823_s13 = smov 0  }
   0x9   :  { %s825_s14 = smov 0   ;;  %s827_s15 = smov 0  }
   0xa   :  { %s829_s16 = smov 0   ;;  %s831_s17 = smov 0  }
   0xb LB: > { %1025 = sst [smem:[#allocation15_spill]] %s788_s16  ;;  %s852_s18 = sadd.s32 4294967295, %s792_s17   ;;  %s792_s17 = sphi %s831_s17, %s22_s17   ;;  %s788_s16 = sphi %s829_s16, %s1039_s16   ;;  %s784_s15 = sphi %s827_s15, %s1038_s15   ;;  %s780_s14 = sphi %s825_s14, %s1042_s14   ;;  %s776_s13 = sphi %s823_s13, %s1041_s13   ;;  %s772_s12 = sphi %s821_s12, %s1040_s12  }
   0xc   : > { %s519_s19 = sadd.s32 4294967294, %s792_s17   ;;  %s34_s20 = sadd.s32 1, %s788_s16 }
   0xd   : > { %s43_s21 = sadd.s32 1, %s780_s14  ;;  %p36_p0 = scmp.ge.s32.totalorder %s34_s20, 2 }
   0xe   : > { %p50_p1 = scmp.ne.s32.totalorder %s780_s14, %s776_s13  ;;  %p51_p2 = scmp.eq.s32.totalorder %s792_s17, 0 }
   0xf   : > { %p56_p3 = scmp.ne.s32.totalorder %s776_s13, %s772_s12  ;;  %s1044_s20 = smov (%p36_p0, %s34_s20), 0 }
  0x10   : > { %1026 = sst [smem:[#allocation16_spill]] %s1044_s20  ;;  %p864_p4 = por %p51_p2, %p50_p1 }
  0x11   : > { %p57_p5 = scmp.eq.s32.totalorder %s852_s18, 0  ;;  %s40_s23 = ssub.s32 %s788_s16, %s1044_s20 }
  0x12   : > { %p136_p6 = scmp.eq.s32.totalorder %s852_s18, 1  ;;  %p41_p7 = scmp.eq.s32.totalorder %s40_s23, 0 }
  0x13   : > { %p872_p8 = por %p57_p5, %p56_p3  ;;  %p142_p10 = scmp.eq.s32.totalorder %s519_s19, 1 }
  0x14   : > { %p876_p9 = por %p136_p6, %p50_p1  ;;  %p521_p12 = scmp.ge.s32.totalorder %s792_s17, 2 }
  0x15   : > { %s881_s26 = scalar_select %p41_p7, %s780_s14, %s43_s21  }
  0x16   : > { %p883_p11 = por %p142_p10, %p56_p3  ;;  %p569_p13 = scmp.lt.s32.totalorder %s792_s17, 2 }
  0x17   : > { %1030 = sst [smem:[#allocation17_spill]] %s881_s26  ;;  %s890_s28 = sand.u32 1, %s780_s14  }
  0x18   : > { %s522_s29 = sshll.u32 %s890_s28, 5  ;;  %s894_s30 = sshll.u32 %s788_s16, 7 }
  0x19   : > { %p898_p0 = pnand %p569_p13, %p864_p4  ;;  %s183_s5 = sand.u32 1, %s792_s17  }
  0x1a   : > { %s1033_s1 = sld [smem:[#allocation19_spill]]  ;;  %s187_s9 = scalar_lea.vmem [#allocation8], %s522_s29 }
  0x1b   : > { %s194_s10 = sshll.u32 %s187_s9, 4  ;;  %p528_p1 = scmp.ge.s32.totalorder %s792_s17, 1  ;;  %s195_s10 = int_to_ptr.vmem [resolvable:$true] %s194_s10 }
  0x1c   : > { %s910_s11 = scalar_lea.sflag [#allocation9], %s183_s5  ;;  %p626_p2 = pneg %p898_p0 }
  0x1d   : > { %s637_s19 = scalar_lea.vmem %s195_s10, 512  ;;  %s794_s21 = smov [#allocation8]  }
  0x1e   : > { %p638_p3 = scmp.ne.s32.totalorder %s195_s10, %s637_s19  ;;  %s642_s22 = sshll.u32 %s794_s21, 4  ;;  %s643_s22 = int_to_ptr.vmem [resolvable:$false] %s642_s22 }
  0x1f   : > { %s644_s23 = scalar_lea.vmem %s643_s22, 1024  ;;  %p645_p6 = scmp.lt.s32.totalorder %s195_s10, %s643_s22 }
  0x20   : > { %s193_s8 = scalar_lea.hbm %s1033_s1, %s894_s30  ;;  %p640_p4 = pnand %p638_p3, %p626_p2 }
  0x21   : > { %p646_p7 = scmp.lt.s32.totalorder %s644_s23, %s637_s19 }
  0x22   : > { %p641_p5 = pneg %p640_p4 }
  0x23   : > { %p647_p10 = por %p646_p7, %p645_p6 }
  0x25   : > { %p648_p13 = pnand %p647_p10, %p641_p5 }
  0x27   : > { %651 = shalt.err (!%p648_p13)
}
  0x28   : > { %s1022_s6 = smov 256   ;;  %s796_s5 = smov 128  }
  0x29   : > { %s797_s7 = smov 8   ;;  %p221_p3 = scmp.lt.s32.totalorder %s792_s17, 3 }
  0x2a   : > { %561 = dma.hbm_to_vmem [thread:$0]  (!%p898_p0), %s193_s8, 512, %s195_s10, %s910_s11, %s1022_s6, %s796_s5, %s797_s7  }
  0x2b   : > { %p924_p4 = pnand %p528_p1, %p221_p3  ;;  %s1035_s0 = sld [smem:[#allocation18_spill]] }
  0x2c   : > { %s166_s23 = scalar_lea.vmem [#allocation5], %s522_s29  ;;  %s526_s20 = sshll.u32 %s890_s28, 3 }
  0x2d   : > { %s173_s1 = sshll.u32 %s166_s23, 4  ;;  %s163_s16 = scalar_lea.sflag [#allocation6], %s890_s28  ;;  %s174_s1 = int_to_ptr.vmem [resolvable:$true] %s173_s1 }
  0x2e   : > { %s665_s26 = scalar_lea.vmem %s174_s1, 512  ;;  %s798_s8 = smov [#allocation5]  }
  0x2f   : > { %p666_p5 = scmp.ne.s32.totalorder %s174_s1, %s665_s26  ;;  %s670_s10 = sshll.u32 %s798_s8, 4  ;;  %s671_s10 = int_to_ptr.vmem [resolvable:$false] %s670_s10 }
  0x30   : > { %s672_s6 = scalar_lea.vmem %s671_s10, 1024  ;;  %p673_p1 = scmp.lt.s32.totalorder %s174_s1, %s671_s10 }
  0x31   : > { %s172_s22 = scalar_lea.hbm %s1035_s0, %s894_s30  ;;  %p668_p6 = pnand %p666_p5, %p626_p2 }
  0x32   : > { %p674_p10 = scmp.lt.s32.totalorder %s672_s6, %s665_s26 }
  0x33   : > { %p669_p7 = pneg %p668_p6 }
  0x34   : > { %p675_p13 = por %p674_p10, %p673_p1 }
  0x36   : > { %p676_p3 = pnand %p675_p13, %p669_p7 }
  0x38   : > { %679 = shalt.err (!%p676_p3)
}
  0x39   : > { %s1036_s29 = smov 256   ;;  %s214_s21 = scalar_lea.hbm %s1018_s2, %s894_s30 }
  0x3a   : > { %558 = dma.hbm_to_vmem [thread:$0]  (!%p898_p0), %s172_s22, 512, %s174_s1, %s163_s16, %s1036_s29, %s796_s5, %s797_s7  }
  0x3b   : > { %s208_s23 = scalar_lea.vmem [#allocation10], %s526_s20  ;;  %s799_s26 = smov [#allocation10]  }
  0x3c   : > { %s216_s0 = sshll.u32 %s208_s23, 4  ;;  %s698_s6 = sshll.u32 %s799_s26, 4  ;;  %s217_s0 = int_to_ptr.vmem [resolvable:$true] %s216_s0  ;;  %s699_s6 = int_to_ptr.vmem [resolvable:$false] %s698_s6 }
  0x3d   : > { %s693_s8 = scalar_lea.vmem %s217_s0, 128  ;;  %s700_s10 = scalar_lea.vmem %s699_s6, 256 }
  0x3e   : > { %p694_p5 = scmp.ne.s32.totalorder %s217_s0, %s693_s8  ;;  %p701_p1 = scmp.lt.s32.totalorder %s217_s0, %s699_s6 }
  0x3f   : > { %p702_p10 = scmp.lt.s32.totalorder %s700_s10, %s693_s8 }
  0x40   : > { %p696_p6 = pnand %p694_p5, %p626_p2 }
  0x41   : > { %p703_p13 = por %p702_p10, %p701_p1 }
  0x42   : > { %p697_p7 = pneg %p696_p6 }
  0x44   : > { %p704_p3 = pnand %p703_p13, %p697_p7 }
  0x46   : > { %707 = shalt.err (!%p704_p3)
}
  0x47   : > { %564 = dma.hbm_to_vmem [thread:$0]  (!%p898_p0), %s214_s21, 128, %s217_s0, %s910_s11  }
  0x48   : > { %225 = sbr.rel (%p924_p4) target bundleno = 337 (0x151), region = 32  ;;  %s955_s1 = sand.u32 (!%p924_p4), 1, %s776_s13  }
  0x49   : > { %s529_s16 = sshll.u32 (!%p924_p4), %s955_s1, 5  ;;  %s228_s20 = scalar_lea.sflag (!%p924_p4), [#allocation6], %s955_s1 }
  0x4a   : > { %s231_s30 = scalar_lea.vmem (!%p924_p4), [#allocation5], %s529_s16 }
  0x4d   : > { %759 = dma.done.wait (%p872_p8), %s228_s20, 512  }
  0x4e   : > { %761 = vsyncadd (%p872_p8), %s228_s20, 4294966784  ;;  %s236_s0 = sand.u32 1, %s852_s18   ;;  %s240_s11 = scalar_lea.vmem [#allocation8], %s529_s16 }
  0x4f   : > { %s237_s4 = scalar_lea.sflag [#allocation9], %s236_s0 }
  0x50   : > { %763 = dma.done.wait (%p872_p8), %s237_s4, 640  }
  0x51   : > { %765 = vsyncadd (%p872_p8), %s237_s4, 4294966656  ;;  %s531_s5 = sshll.u32 %s955_s1, 3  ;;  %v291_v0 = vld [vmem:[%s231_s30] sm:$0xff]  ;;  %v532_v2 = vld [vmem:[%s231_s30 + $0x8] sm:$0xff]  ;;  %v373_v53 = vlaneseq  ;;  %s538_s9 = sshll.u32 %s784_s15, 4 }
  0x52   : > { %v292_v1 = vld [vmem:[%s240_s11] sm:$0xff]  ;;  %v533_v4 = vld [vmem:[%s240_s11 + $0x8] sm:$0xff]  ;;  %v534_v5 = vld [vmem:[%s231_s30 + $0x10] sm:$0xff]  ;;  %s249_s18 = scalar_lea.vmem [#allocation10], %s531_s5  ;;  %s280_s29 = scalar_lea.vmem [#allocation11], %s955_s1 }
  0x53   : > { %v293_v3 = vsub.f32 %v291_v0, %v292_v1  ;;  %v535_v6 = vld [vmem:[%s240_s11 + $0x10] sm:$0xff]  ;;  %v300_v7 = vsub.f32 %v532_v2, %v533_v4  ;;  %v536_v9 = vld [vmem:[%s231_s30 + $0x18] sm:$0xff]  ;;  %v337_v11 = vld [vmem:[%s249_s18] sm:$0xff]  ;;  %v374_v54 = vand.u32 127, %v373_v53  ;;  %s398_s28 = sshll.u32 %s280_s29, 4  ;;  %s974_s23 = scalar_lea.hbm %s1019_s3, %s538_s9  ;;  %s399_s28 = int_to_ptr.vmem [resolvable:$true] %s398_s28 }
  0x54   : > { %v308_v8 = vsub.f32 %v534_v5, %v535_v6  ;;  %v537_v10 = vld [vmem:[%s240_s11 + $0x18] sm:$0xff]  ;;  %364 = vadd.xlane.f32.xlu1 %v337_v11  ;;  %s386_s15 = scalar_lea.sflag [#allocation7], %s955_s1  ;;  %s708_s8 = scalar_lea.vmem %s399_s28, 16 }
  0x55   : > { %v294_v12 = vadd.f32 1e-06, %v293_v3  ;;  %v316_v13 = vsub.f32 %v536_v9, %v537_v10  ;;  %v301_v14 = vadd.f32 1e-06, %v300_v7  ;;  %vm377_vm2 = vcmp.eq.s32.totalorder %v374_v54, 2  ;;  %p709_p8 = scmp.ne.s32.totalorder %s399_s28, %s708_s8  ;;  %s800_s26 = smov [#allocation11]  }
  0x56   : > { %v309_v15 = vadd.f32 1e-06, %v308_v8  ;;  %vm376_vm3 = vcmp.eq.s32.totalorder %v374_v54, 1  ;;  %vm375_vm4 = vcmp.eq.s32.totalorder %v374_v54, 0  ;;  %s712_s6 = sshll.u32 %s800_s26, 4  ;;  %s713_s6 = int_to_ptr.vmem [resolvable:$false] %s712_s6 }
  0x57   : > { %v295_v16 = vmul.f32 %v294_v12, %v294_v12  ;;  %v317_v17 = vadd.f32 1e-06, %v316_v13  ;;  %v302_v18 = vmul.f32 %v301_v14, %v301_v14  ;;  %p710_p0 = pnand %p709_p8, %p876_p9  ;;  %s714_s10 = scalar_lea.vmem %s713_s6, 32 }
  0x58   : > { %v310_v19 = vmul.f32 %v309_v15, %v309_v15  ;;  %p715_p4 = scmp.lt.s32.totalorder %s399_s28, %s713_s6  ;;  %p716_p5 = scmp.lt.s32.totalorder %s714_s10, %s708_s8 }
  0x59   : > { %v303_v20 = vadd.f32 %v302_v18, %v295_v16  ;;  %v318_v21 = vmul.f32 %v317_v17, %v317_v17  ;;  %p711_p2 = pneg %p710_p0 }
  0x5a   : > { %p717_p6 = por %p716_p5, %p715_p4 }
  0x5b   : > { %v311_v22 = vadd.f32 %v310_v19, %v303_v20 }
  0x5c   : > { %p718_p7 = pnand %p717_p6, %p711_p2 }
  0x5d   : > { %v319_v23 = vadd.f32 %v318_v21, %v311_v22 }
  0x5f   : > { %344 = vadd.xlane.f32.xlu0 %v319_v23  ;;  %622 = vrsqrt.f32 %v319_v23  ;;  %vm322_vm0 = vcmp.eq.f32.partialorder %v319_v23, inf  ;;  %v325_v25 = vand.u32 2147483648, %v319_v23  ;;  %vm324_vm1 = vcmp.eq.f32.partialorder %v319_v23, 0.0 }
  0x6c   : > { %v623_v24 = vpop.eup %622 }
  0x6d   : > { %v321_v26 = vmul.f32 %v623_v24, %v319_v23 }
  0x6f   : > { %v323_v27 = vsel %vm322_vm0, %v319_v23, %v321_v26 }
  0x70   : > { %v326_v28 = vsel %vm324_vm1, %v325_v25, %v323_v27 }
  0x71   : > { %v327_v29 = vsub.f32 2.0, %v326_v28 }
  0x73   : > { %v328_v30 = vmax.f32 %v327_v29, 0.0 }
  0x75   : > { %v333_v31 = vmul.f32 %v328_v30, %v328_v30 }
  0x77   : > { %354 = vadd.xlane.f32.xlu0 %v333_v31 }
  0xdd   : > { %v365_v39 = vpop.xlane.xlu1 %364 }
  0xde   : > { %v366_v40 = vrot.slane %v365_v39, 4 }
  0xe0   : > { %v367_v41 = vadd.f32 %v366_v40, %v365_v39 }
  0xe2   : > { %v368_v42 = vrot.slane %v367_v41, 2 }
  0xe4   : > { %v369_v46 = vadd.f32 %v368_v42, %v367_v41 }
  0xe6   : > { %v370_v49 = vrot.slane %v369_v46, 1 }
  0xe8   : > { %v345_v32 = vpop.xlane.xlu0 %344  ;;  %v371_v52 = vadd.f32 %v370_v49, %v369_v46 }
  0xe9   : > { %v346_v33 = vrot.slane %v345_v32, 4 }
  0xeb   : > { %v347_v34 = vadd.f32 %v346_v33, %v345_v32 }
  0xed   : > { %v348_v35 = vrot.slane %v347_v34, 2 }
  0xef   : > { %v349_v36 = vadd.f32 %v348_v35, %v347_v34 }
  0xf1   : > { %v350_v37 = vrot.slane %v349_v36, 1 }
  0xf3   : > { %v351_v38 = vadd.f32 %v350_v37, %v349_v36 }
  0xf5   : > { %541 = vpush %v351_v38 }
 0x100   : > { %v355_v43 = vpop.xlane.xlu0 %354 }
 0x101   : > { %v356_v44 = vrot.slane %v355_v43, 4 }
 0x103   : > { %v357_v45 = vadd.f32 %v356_v44, %v355_v43 }
 0x105   : > { %v358_v47 = vrot.slane %v357_v45, 2 }
 0x107   : > { %v359_v48 = vadd.f32 %v358_v47, %v357_v45 }
 0x109   : > { %v360_v50 = vrot.slane %v359_v48, 1 }
 0x10b   : > { %v361_v51 = vadd.f32 %v360_v50, %v359_v48 }
 0x10d   : > { %543 = vpush %v361_v51 }
 0x10e   : > { %545 = vpush %v371_v52 }
 0x126   : > { %s542_s24 = spop %541 }
 0x127   : > { %v382_v58 = vstv %s542_s24 }
 0x13e   : > { %s544_s7 = spop %543 }
 0x13f   : > { %v380_v55 = vstv %s544_s7  ;;  %s546_s22 = spop %545 }
 0x140   : > { %v378_v56 = vstv %s546_s22 }
 0x141   : > { %v379_v57 = vsel %vm377_vm2, %v378_v56, 0.0 }
 0x142   : > { %v381_v59 = vsel %vm376_vm3, %v380_v55, %v379_v57 }
 0x143   : > { %v383_v60 = vsel %vm375_vm4, %v382_v58, %v381_v59 }
 0x144   : > { %384 = vst [vmem:[%s280_s29] sm:$0x1] %v383_v60 }
 0x145   : > { %721 = shalt.err (!%p718_p7)
}
 0x146   : > { %s722_s16 = scalar_lea.hbm %s974_s23, 16  ;;  %s726_s30 = scalar_lea.hbm %s1019_s3, 32 }
 0x147   : > { %p723_p1 = scmp.ne.s32.totalorder %s974_s23, %s722_s16  ;;  %p727_p3 = scmp.lt.s32.totalorder %s974_s23, %s1019_s3 }
 0x148   : > { %p728_p8 = scmp.lt.s32.totalorder %s726_s30, %s722_s16 }
 0x149   : > { %p724_p10 = pnand %p723_p1, %p876_p9 }
 0x14a   : > { %p729_p0 = por %p728_p8, %p727_p3 }
 0x14b   : > { %p725_p13 = pneg %p724_p10 }
 0x14d   : > { %p730_p2 = pnand %p729_p0, %p725_p13 }
 0x14f   : > { %733 = shalt.err (!%p730_p2)
}
 0x150   : > { %553 = dma.vmem_to_hbm [thread:$0]  (%p876_p9), %s399_s28, 16, %s974_s23, %s386_s15  }
 0x151 PF: > { %s410_s11 = sand.u32 1, %s772_s12   ;;  %p566_p4 = pnand %p521_p12, %p883_p11 }
 0x152   : > { %s411_s5 = scalar_lea.sflag [#allocation7], %s410_s11 }
 0x153   : > { %p567_p5 = pneg %p566_p4 }
 0x155   : > { %767 = dma.done.wait (%p567_p5), %s411_s5, 16  }
 0x156   : > { %769 = vsyncadd (%p567_p5), %s411_s5, 4294967280  ;;  %s22_s17 = sadd.s32 1, %s792_s17   ;;  %s1037_s25 = sld [smem:[#allocation17_spill]] }
 0x157   : > { %p19_p6 = scmp.ge.s32.totalorder %s22_s17, 4   ;;  %s1038_s15 = sld [smem:[#allocation15_spill]] }
 0x158   : > { %s1039_s16 = sld [smem:[#allocation16_spill]]  ;;  %s1040_s12 = smov %s776_s13 }
 0x159   : > { %s1041_s13 = smov %s780_s14  ;;  %21 = sbr.rel (!%p19_p6) target bundleno = 11 (0xb), region = 115 }
 0x15c   : > { %s1042_s14 = smov %s1037_s25 }
 0x15e   :  { %415 = vsyncpa [#allocation6], 1 }
 0x15f   :  { %417 = vsyncpa [#allocation6 + $0x1], 1 }
 0x160   :  { %418 = vsyncpa [#allocation9], 1 }
 0x161   :  { %420 = vsyncpa [#allocation9 + $0x1], 1 }
 0x162   :  { %421 = vsyncpa [#allocation7], 1 }
 0x163   :  { %423 = vsyncpa [#allocation7 + $0x1], 1 }

</bundles_post_ra>
